<compile_context>
chip_gen: v6e
topology: v6e:2x2x1
jax: 0.10.0
libtpu: 0.0.40
codegen_flags: <defaults>
</compile_context>

<pallas_src>
import math

import jax
import jax.numpy as jnp
from jax.experimental import pallas as pl
from jax.experimental.pallas import tpu as pltpu


def attention_kernel(hidden_ref, enc_ref, wh_ref, we_ref, b_ref, v_ref, out_ref):
    # hidden_ref: [Bt, Hd]   bf16      wh_ref: [Hd, Hd] bf16
    # enc_ref:    [Bt, S, E] bf16      we_ref: [E,  Hd] bf16
    # b_ref:      [1, Hd]    f32       v_ref:  [1,  Hd] f32
    # out_ref:    [Bt, S]    f32       (softmax over the last axis == src_len)
    Bt, S, E = enc_ref.shape
    Hd = wh_ref.shape[1]

    # Hidden projection, bias folded in once per batch row (f32 accumulation).
    hb = jnp.dot(hidden_ref[...], wh_ref[...],
                 preferred_element_type=jnp.float32) + b_ref[...]        # [Bt, Hd]

    # Encoder projection on a flat 2-D slab (bf16 in / f32 out on the MXU).
    # The (Bt, S, E) -> (Bt*S, E) collapse only merges sublane-major dims (the
    # lane axis E is untouched), so it does not force a VMEM relayout copy.
    e_proj = jnp.dot(enc_ref[...].reshape(Bt * S, E), we_ref[...],
                     preferred_element_type=jnp.float32)                 # [Bt*S, Hd]

    # Additive attention energy; Hd stays on the lane axis, src_len on sublanes.
    act = jnp.tanh(e_proj.reshape(Bt, S, Hd) + hb[:, None, :])           # [Bt, S, Hd]

    # v-projection as VPU multiply + cross-lane (XLU) reduction — no 1-wide matmul.
    scores = jnp.sum(act * v_ref[...][None, :, :], axis=-1)              # [Bt, S]

    # Numerically stable softmax over src_len (last axis -> lane-dense output).
    m = jnp.max(scores, axis=-1, keepdims=True)
    e = jnp.exp(scores - m)
    denom = jnp.sum(e, axis=-1, keepdims=True)
    out_ref[...] = e * pl.reciprocal(denom, approx=True)                 # EUP vrcp


def attention_pallas(hidden, enc_outputs, W_att, b_att, v_w, *, b_tile=None):
    """hidden: [1, B, Hd], enc_outputs: [S, B, E].  Returns [S, B] (f32)."""
    S, B, E = enc_outputs.shape
    Hd = hidden.shape[-1]

    # Split the concat-Linear weight: columns [0:Hd] hit the repeated hidden,
    # columns [Hd:Hd+E] hit enc_outputs (concat order in forward is (hidden, enc)).
    wh = W_att[:, :Hd].T.astype(jnp.bfloat16)          # [Hd, Hd]
    we = W_att[:, Hd:].T.astype(jnp.bfloat16)          # [E, Hd]
    b2 = b_att.reshape(1, Hd).astype(jnp.float32)      # [1, Hd]
    vr = v_w.reshape(1, Hd).astype(jnp.float32)        # [1, Hd]

    hidden2d = hidden.reshape(B, Hd).astype(jnp.bfloat16)
    # Batch-major layout so each grid step DMAs one contiguous (Bt, S, E) tile; in
    # an RNN decode loop enc_outputs is fixed, so this transpose/cast is hoistable.
    enc_bse = jnp.transpose(enc_outputs, (1, 0, 2)).astype(jnp.bfloat16)   # [B, S, E]

    if b_tile is None:
        # Size the batch tile so double-buffered enc tiles + f32 intermediates stay
        # well under the v7x 64 MiB VMEM (larger tiles are fine on v5e/v6e too).
        per_row_bytes = 2 * S * E + 4 * S * Hd        # bf16 enc row + f32 energies
        budget = 4 * 1024 * 1024
        rows = max(8, budget // max(per_row_bytes, 1))
        b_tile = int(min(B, 256, rows))
    if b_tile < B:
        b_tile = max(8, (b_tile // 8) * 8)            # sublane-aligned partial tiles
    b_tile = min(b_tile, B)

    grid = (pl.cdiv(B, b_tile),)

    cost = pl.CostEstimate(
        flops=2 * B * S * E * Hd + 2 * B * Hd * Hd + 2 * B * S * Hd,
        transcendentals=B * S * Hd + B * S,
        bytes_accessed=(B * S * E * 2 + B * Hd * 2
                        + (Hd + E) * Hd * 2 + 2 * Hd * 4 + B * S * 4),
    )

    out_bs = pl.pallas_call(
        attention_kernel,
        out_shape=jax.ShapeDtypeStruct((B, S), jnp.float32),
        grid_spec=pltpu.PrefetchScalarGridSpec(
            num_scalar_prefetch=0,
            grid=grid,
            in_specs=[
                pl.BlockSpec((b_tile, Hd), lambda i: (i, 0)),       # hidden
                pl.BlockSpec((b_tile, S, E), lambda i: (i, 0, 0)),  # enc (batch-tiled)
                pl.BlockSpec((Hd, Hd), lambda i: (0, 0)),           # Wh (resident)
                pl.BlockSpec((E, Hd), lambda i: (0, 0)),            # We (resident)
                pl.BlockSpec((1, Hd), lambda i: (0, 0)),            # bias (resident)
                pl.BlockSpec((1, Hd), lambda i: (0, 0)),            # v row (resident)
            ],
            out_specs=pl.BlockSpec((b_tile, S), lambda i: (i, 0)),
        ),
        compiler_params=pltpu.CompilerParams(
            dimension_semantics=("parallel",),        # batch tiles across TCs (v7x)
            vmem_limit_bytes=48 * 1024 * 1024,
        ),
        cost_estimate=cost,
    )(hidden2d, enc_bse, wh, we, b2, vr)

    # Back to the PyTorch layout [S, B]; softmax was taken over S inside the kernel.
    return out_bs.T


def attention_ref(hidden, enc_outputs, W_att, b_att, v_w):
    """Pure-JAX f32 reference mirroring the PyTorch forward."""
    S = enc_outputs.shape[0]
    h = jnp.repeat(hidden, S, axis=0)                       # [S, B, Hd]
    cat = jnp.concatenate([h, enc_outputs], axis=2)         # [S, B, Hd+E]
    att = jnp.tanh(cat @ W_att.T + b_att)                   # [S, B, Hd]
    scores = (att @ v_w.T)[..., 0]                          # [S, B]
    return jax.nn.softmax(scores, axis=0)


if __name__ == "__main__":
    dec_hid_dim = 32
    enc_output_dim = 64
    src_len = 8
    batch = 2

    key = jax.random.PRNGKey(0)
    k_h, k_e, k_w, k_b, k_v = jax.random.split(key, 5)

    # Deterministic "PyTorch-style" parameter init (uniform +-1/sqrt(fan_in)).
    in_feat = enc_output_dim + dec_hid_dim
    bnd_att = 1.0 / math.sqrt(in_feat)
    W_att = jax.random.uniform(k_w, (dec_hid_dim, in_feat),
                               minval=-bnd_att, maxval=bnd_att, dtype=jnp.float32)
    b_att = jax.random.uniform(k_b, (dec_hid_dim,),
                               minval=-bnd_att, maxval=bnd_att, dtype=jnp.float32)
    bnd_v = 1.0 / math.sqrt(dec_hid_dim)
    v_w = jax.random.uniform(k_v, (1, dec_hid_dim),
                             minval=-bnd_v, maxval=bnd_v, dtype=jnp.float32)

    hidden = jax.random.normal(k_h, (1, batch, dec_hid_dim), dtype=jnp.float32)
    enc_outputs = jax.random.normal(k_e, (src_len, batch, enc_output_dim),
                                    dtype=jnp.float32)

    out = attention_pallas(hidden, enc_outputs, W_att, b_att, v_w)
    out = jax.block_until_ready(out)

    ref = attention_ref(hidden, enc_outputs, W_att, b_att, v_w)
    assert out.shape == (src_len, batch)
    # bf16 MXU inputs + approx reciprocal -> loosened tolerance vs f32 reference.
    assert jnp.allclose(out, ref, atol=2e-2, rtol=2e-2), "mismatch vs reference"
    # softmax sanity: each column sums to 1 (approx reciprocal -> loose tol).
    assert jnp.allclose(jnp.sum(out, axis=0), jnp.ones((batch,)), atol=1e-2)

    print("KERNEL_OK")
</pallas_src>

<mosaic_0001>
module attributes {stable_mosaic.version = 11 : i64} {
  func.func @attention_kernel(%arg0: i32, %arg1: memref<2x32xbf16, #tpu.memory_space<vmem>>, %arg2: memref<2x8x64xbf16, #tpu.memory_space<vmem>>, %arg3: memref<32x32xbf16, #tpu.memory_space<vmem>>, %arg4: memref<64x32xbf16, #tpu.memory_space<vmem>>, %arg5: memref<1x32xf32, #tpu.memory_space<vmem>>, %arg6: memref<1x32xf32, #tpu.memory_space<vmem>>, %arg7: memref<2x8xf32, #tpu.memory_space<vmem>>) attributes {dimension_semantics = [#tpu.dimension_semantics<parallel>], iteration_bounds = array<i64: 1>, scalar_prefetch = 0 : i64, scratch_operands = 0 : i64, tpu.core_type = #tpu.core_type<tc>, window_params = [{transform_indices = @transform_0, window_bounds = array<i64: 2, 32>}, {transform_indices = @transform_1, window_bounds = array<i64: 2, 8, 64>}, {pipeline_mode = #tpu.pipeline_mode<synchronous>, transform_indices = @transform_2, window_bounds = array<i64: 32, 32>}, {pipeline_mode = #tpu.pipeline_mode<synchronous>, transform_indices = @transform_3, window_bounds = array<i64: 64, 32>}, {pipeline_mode = #tpu.pipeline_mode<synchronous>, transform_indices = @transform_4, window_bounds = array<i64: 1, 32>}, {pipeline_mode = #tpu.pipeline_mode<synchronous>, transform_indices = @transform_5, window_bounds = array<i64: 1, 32>}, {transform_indices = @transform_6, window_bounds = array<i64: 2, 8>}]} {
    %c0 = arith.constant 0 : index
    %c0_0 = arith.constant 0 : index
    %0 = vector.load %arg1[%c0, %c0_0] : memref<2x32xbf16, #tpu.memory_space<vmem>>, vector<2x32xbf16>
    %c0_1 = arith.constant 0 : index
    %c0_2 = arith.constant 0 : index
    %1 = vector.load %arg3[%c0_1, %c0_2] : memref<32x32xbf16, #tpu.memory_space<vmem>>, vector<32x32xbf16>
    %cst = arith.constant dense<0.000000e+00> : vector<2x32xf32>
    %2 = tpu.matmul %0, %1, %cst {dimension_numbers = #tpu.dot_dimension_numbers<[1], [0], [0], [1], [0, 0, 1, 1], [], []>} : vector<2x32xbf16>, vector<32x32xbf16>, vector<2x32xf32> -> vector<2x32xf32>
    %c0_3 = arith.constant 0 : index
    %c0_4 = arith.constant 0 : index
    %3 = vector.load %arg5[%c0_3, %c0_4] : memref<1x32xf32, #tpu.memory_space<vmem>>, vector<1x32xf32>
    %4 = vector.broadcast %3 : vector<1x32xf32> to vector<2x32xf32>
    %5 = arith.addf %2, %4 : vector<2x32xf32>
    %c0_5 = arith.constant 0 : index
    %c0_6 = arith.constant 0 : index
    %c0_7 = arith.constant 0 : index
    %6 = vector.load %arg2[%c0_5, %c0_6, %c0_7] : memref<2x8x64xbf16, #tpu.memory_space<vmem>>, vector<2x8x64xbf16>
    %7 = vector.shape_cast %6 : vector<2x8x64xbf16> to vector<16x64xbf16>
    %c0_8 = arith.constant 0 : index
    %c0_9 = arith.constant 0 : index
    %8 = vector.load %arg4[%c0_8, %c0_9] : memref<64x32xbf16, #tpu.memory_space<vmem>>, vector<64x32xbf16>
    %cst_10 = arith.constant dense<0.000000e+00> : vector<16x32xf32>
    %9 = tpu.matmul %7, %8, %cst_10 {dimension_numbers = #tpu.dot_dimension_numbers<[1], [0], [0], [1], [0, 0, 1, 1], [], []>} : vector<16x64xbf16>, vector<64x32xbf16>, vector<16x32xf32> -> vector<16x32xf32>
    %10 = vector.shape_cast %9 : vector<16x32xf32> to vector<2x8x32xf32>
    %11 = vector.shape_cast %5 : vector<2x32xf32> to vector<2x1x32xf32>
    %12 = vector.broadcast %11 : vector<2x1x32xf32> to vector<2x8x32xf32>
    %13 = arith.addf %10, %12 : vector<2x8x32xf32>
    %14 = math.tanh %13 : vector<2x8x32xf32>
    %c0_11 = arith.constant 0 : index
    %c0_12 = arith.constant 0 : index
    %15 = vector.load %arg6[%c0_11, %c0_12] : memref<1x32xf32, #tpu.memory_space<vmem>>, vector<1x32xf32>
    %16 = vector.shape_cast %15 : vector<1x32xf32> to vector<1x1x32xf32>
    %17 = vector.broadcast %16 : vector<1x1x32xf32> to vector<2x8x32xf32>
    %18 = arith.mulf %14, %17 : vector<2x8x32xf32>
    %cst_13 = arith.constant dense<0.000000e+00> : vector<2x8xf32>
    %19 = vector.multi_reduction <add>, %18, %cst_13 [2] : vector<2x8x32xf32> to vector<2x8xf32>
    %cst_14 = arith.constant dense<0xFF800000> : vector<2xf32>
    %20 = vector.multi_reduction <maximumf>, %19, %cst_14 [1] : vector<2x8xf32> to vector<2xf32>
    %21 = vector.shape_cast %20 : vector<2xf32> to vector<2x1xf32>
    %22 = vector.broadcast %21 : vector<2x1xf32> to vector<2x8xf32>
    %23 = arith.subf %19, %22 : vector<2x8xf32>
    %24 = math.exp %23 : vector<2x8xf32>
    %cst_15 = arith.constant dense<0.000000e+00> : vector<2xf32>
    %25 = vector.multi_reduction <add>, %24, %cst_15 [1] : vector<2x8xf32> to vector<2xf32>
    %26 = vector.shape_cast %25 : vector<2xf32> to vector<2x1xf32>
    %27 = tpu.reciprocal %26 {approx = true} : vector<2x1xf32> -> vector<2x1xf32>
    %28 = vector.broadcast %27 : vector<2x1xf32> to vector<2x8xf32>
    %29 = arith.mulf %24, %28 : vector<2x8xf32>
    %c0_16 = arith.constant 0 : index
    %c0_17 = arith.constant 0 : index
    %30 = vector.load %arg7[%c0_16, %c0_17] : memref<2x8xf32, #tpu.memory_space<vmem>>, vector<2x8xf32>
    tpu.vector_store %arg7[%c0_16, %c0_17], %29 {strides = array<i32>} : memref<2x8xf32, #tpu.memory_space<vmem>>, vector<2x8xf32>,
    return
  }
  func.func @transform_0(%arg0: i32) -> (i32, i32) {
    %c0_i32 = arith.constant 0 : i32
    %c0_i32_0 = arith.constant 0 : i32
    return %arg0, %c0_i32 : i32, i32
  }
  func.func @transform_1(%arg0: i32) -> (i32, i32, i32) {
    %c0_i32 = arith.constant 0 : i32
    %c0_i32_0 = arith.constant 0 : i32
    %c0_i32_1 = arith.constant 0 : i32
    return %arg0, %c0_i32, %c0_i32_0 : i32, i32, i32
  }
  func.func @transform_2(%arg0: i32) -> (i32, i32) {
    %c0_i32 = arith.constant 0 : i32
    %c0_i32_0 = arith.constant 0 : i32
    %c0_i32_1 = arith.constant 0 : i32
    return %c0_i32, %c0_i32_0 : i32, i32
  }
  func.func @transform_3(%arg0: i32) -> (i32, i32) {
    %c0_i32 = arith.constant 0 : i32
    %c0_i32_0 = arith.constant 0 : i32
    %c0_i32_1 = arith.constant 0 : i32
    return %c0_i32, %c0_i32_0 : i32, i32
  }
  func.func @transform_4(%arg0: i32) -> (i32, i32) {
    %c0_i32 = arith.constant 0 : i32
    %c0_i32_0 = arith.constant 0 : i32
    %c0_i32_1 = arith.constant 0 : i32
    return %c0_i32, %c0_i32_0 : i32, i32
  }
  func.func @transform_5(%arg0: i32) -> (i32, i32) {
    %c0_i32 = arith.constant 0 : i32
    %c0_i32_0 = arith.constant 0 : i32
    %c0_i32_1 = arith.constant 0 : i32
    return %c0_i32, %c0_i32_0 : i32, i32
  }
  func.func @transform_6(%arg0: i32) -> (i32, i32) {
    %c0_i32 = arith.constant 0 : i32
    %c0_i32_0 = arith.constant 0 : i32
    return %arg0, %c0_i32 : i32, i32
  }
}

</mosaic_0001>

<bundles_post_ra>
// kernel: tpu_custom_call.1
= control target key start
LH: loop header
LB: loop body
LE: loop exit
PB: predicated region body
PF: predicated region fallthrough
CT: control target
= control target key end

     0   :  { %v418_v1 = vmov 0.0   ;;  %vm419_vm0 = vmmov 0   ;;  %vm49_vm1 = vcmask 261120   ;;  %s512_s0 = inlined_call_operand.vmem [shape: bf16[2,32], index: 0, kind: input, shape index: {}]   ;;  %s513_s1 = inlined_call_operand.vmem [shape: bf16[2,8,64], index: 1, kind: input, shape index: {}]   ;;  %s514_s2 = inlined_call_operand.vmem [shape: bf16[32,32], index: 2, kind: input, shape index: {}]   ;;  %s515_s3 = inlined_call_operand.vmem [shape: bf16[64,32], index: 3, kind: input, shape index: {}]   ;;  %s516_s4 = inlined_call_operand.vmem [shape: f32[1,32], index: 4, kind: input, shape index: {}]   ;;  %s517_s5 = inlined_call_operand.vmem [shape: f32[1,32], index: 5, kind: input, shape index: {}]   ;;  %s518_s6 = inlined_call_operand.hbm [shape: f32[2,8], index: 6, kind: output, shape index: {}]  }
   0x1   :  { %v379_v0 = vld [vmem:[%s514_s2 + $0x8] sm:$0xff]   ;;  %352 = vmatprep.subr.bf16.mxu0 %v418_v1  ;;  %360 = vmatprep.subr.bf16.mxu1 %v418_v1  ;;  %v380_v2 = vld [vmem:[%s515_s3 + $0x18] sm:$0xff]   ;;  %v381_v3 = vld [vmem:[%s514_s2] sm:$0xff]  }
   0x2   :  { %353 = vmatpush3.bf16.msra.mxu0 %v379_v0  ;;  %356 = vmatprep.mubr.msk.bf16.mxu0 %vm419_vm0, %v418_v1  ;;  %v382_v4 = vld [vmem:[%s515_s3 + $0x10] sm:$0xff]   ;;  %v25_v5 = vld [vmem:[%s512_s0] sm:$0x1]  ;;  %v383_v6 = vld [vmem:[%s515_s3 + $0x8] sm:$0xff]  }
   0x3   :  { %361 = vmatpush3.bf16.msra.mxu1 %v380_v2  ;;  %354 = vmatprep.subr.bf16.mxu0 %v418_v1 }
   0x4   :  { %362 = vmatprep.subr.bf16.mxu1 %v418_v1  ;;  %368 = vmatprep.mubr.msk.bf16.mxu1 %vm419_vm0, %v418_v1 }
   0x6   :  { %355 = vmatpush3.bf16.msra.mxu0 %v381_v3 }
   0x7   :  { %363 = vmatpush3.bf16.msra.mxu1 %v382_v4 }
   0x8   :  { %11 = vsyncpa [#allocation3], 0  ;;  %364 = vmatprep.subr.bf16.mxu1 %v418_v1  ;;  %v384_v7 = vld [vmem:[%s515_s3] sm:$0xff]   ;;  %vm132_vm2 = vcmask 523264   ;;  %v420_v9 = vmov 1966171168   ;;  %v181_v11 = vlaneseq }
   0x9   :  { %357 = vmatmul.mubr.msk.bf16.vlgmr.msra.gmra.mxu0 %vm49_vm1, %v25_v5  ;;  %v385_v8 = vld [vmem:[%s513_s1] sm:$0xff]   ;;  %v179_v10 = vunpack.c.l.s4 %v420_v9  ;;  %vm241_vm3 = vcmask 1041409   ;;  %vm244_vm4 = vcmask 58368   ;;  %v421_v49 = vmov 0  }
   0xa   :  { %v483_v13 = vshrl.u32 %v181_v11, 7  ;;  %v333_v14 = vld [vmem:[%s516_s4] ss:$0 sm:$0xff]  ;;  %v232_v41 = vand.u32 127, %v181_v11  ;;  %378 = vset.pattern.permute.xlu0 %v421_v49  ;;  %377 = vset.pattern.permute.xlu1 %v421_v49  ;;  %s422_s4 = smov [#allocation2]  }
   0xb   :  { %365 = vmatpush3.bf16.msra.mxu1 %v383_v6  ;;  %v180_v12 = vunpack.c.0.s8 %v179_v10  ;;  %v343_v34 = vld [vmem:[%s517_s5] ss:$0 sm:$0xff]  ;;  %s325_s5 = sshll.u32 %s422_s4, 4  ;;  %s326_s5 = int_to_ptr.vmem [resolvable:$true] %s325_s5 }
   0xc   :  { %366 = vmatprep.subr.bf16.mxu1 %v418_v1  ;;  %v490_v20 = vsub.s32 0, %v483_v13  ;;  %v235_v43 = vsub.s32 %v232_v41, %v483_v13  ;;  %v255_v50 = vsub.s32 1, %v483_v13  ;;  %s396_s13 = scalar_lea.vmem %s326_s5, 32  ;;  %p401_p1 = scmp.lt.s32.totalorder %s326_s5, %s326_s5 }
   0xd   :  { %v183_v15 = vsub.s32 %v180_v12, %v483_v13  ;;  %p397_p0 = scmp.ne.s32.totalorder %s326_s5, %s396_s13  ;;  %p402_p2 = scmp.lt.s32.totalorder %s396_s13, %s396_s13 }
   0xf   :  { %367 = vmatpush3.bf16.msra.mxu1 %v384_v7  ;;  %p403_p3 = por %p402_p2, %p401_p1 }
  0x11   :  { %p404_p4 = pnand %p403_p3, %p397_p0 }
  0x12   :  { %369 = vmatmul.mubr.msk.bf16.vlgmr.msra.gmra.mxu1 %vm132_vm2, %v385_v8 }
  0xc9   :  { %v87_v16 = vpop.f32.mrf.mxu0 }
  0xca   :  { %v88_v17 = vadd.f32 %v333_v14, %v87_v16 }
  0xcb   :  { %v358_v18 = vpop.f32.mrf.mxu0 }
  0xcc   :  { %v184_v19 = vrot.slane %v88_v17, %v183_v15 }
  0xcd   :  { %v90_v21 = vpop.f32.mrf.mxu0 }
  0xce   :  { %v185_v22 = vcombine.high %v184_v19, %v184_v19  ;;  %v192_v23 = vrot.slane %v184_v19, %v183_v15 }
  0xcf   :  { %v359_v24 = vpop.f32.mrf.mxu0 }
  0xd0   :  { %v203_v25 = vrot.slane %v192_v23, %v490_v20  ;;  %v199_v26 = vrot.slane %v185_v22, %v183_v15 }
  0xd2   :  { %v170_v27 = vpop.f32.mrf.mxu1  ;;  %v207_v30 = vrot.slane %v199_v26, %v490_v20 }
  0xd3   :  { %v210_v28 = vadd.f32 %v203_v25, %v170_v27 }
  0xd4   :  { %v370_v29 = vpop.f32.mrf.mxu1 }
  0xd5   :  { %386 = vtanh.f32 %v210_v28 }
  0xd6   :  { %v173_v31 = vpop.f32.mrf.mxu1 }
  0xd7   :  { %v211_v32 = vadd.f32 %v207_v30, %v173_v31 }
  0xd8   :  { %v371_v33 = vpop.f32.mrf.mxu1 }
  0xd9   :  { %388 = vtanh.f32 %v211_v32 }
  0xe2   :  { %v387_v35 = vpop.eup %386 }
  0xe3   :  { %v221_v36 = vmul.f32 %v387_v35, %v343_v34 }
  0xe5   :  { %v223_v37 = vsel %vm49_vm1, %v221_v36, 0.0 }
  0xe6   :  { %v389_v38 = vpop.eup %388  ;;  %224 = vadd.xlane.f32.xlu0 %v223_v37 }
  0xe7   :  { %v222_v39 = vmul.f32 %v389_v38, %v343_v34 }
  0xe9   :  { %v226_v40 = vsel %vm49_vm1, %v222_v39, 0.0 }
  0xea   :  { %227 = vadd.xlane.f32.xlu0 %v226_v40 }
 0x16f   :  { %v225_v42 = vpop.xlane.xlu0 %224 }
 0x170   :  { %v236_v45 = vrot.slane %v225_v42, %v235_v43 }
 0x173   :  { %v228_v44 = vpop.xlane.xlu0 %227 }
 0x174   :  { %v240_v46 = vrot.slane %v228_v44, %v235_v43 }
 0x176   :  { %v242_v47 = vsel %vm241_vm3, %v240_v46, %v236_v45 }
 0x177   :  { %v245_v48 = vsel %vm244_vm4, %v242_v47, -inf }
 0x178   :  { %246 = vmax.xlane.f32.xlu1 %v245_v48 }
 0x201   :  { %v247_v51 = vpop.xlane.xlu1 %246 }
 0x202   :  { %v252_v52 = vrot.slane %v247_v51, %v490_v20  ;;  %v256_v53 = vrot.slane %v247_v51, %v255_v50 }
 0x204   :  { %v259_v54 = vsub.f32 %v225_v42, %v252_v52  ;;  %v260_v55 = vsub.f32 %v228_v44, %v256_v53 }
 0x206   :  { %v261_v56 = vmul.f32 1.442695, %v259_v54  ;;  %v263_v57 = vmul.f32 1.442695, %v260_v55 }
 0x208   :  { %390 = vpow2.f32 %v261_v56 }
 0x209   :  { %392 = vpow2.f32 %v263_v57 }
 0x215   :  { %v391_v58 = vpop.eup %390 }
 0x216   :  { %v393_v59 = vpop.eup %392  ;;  %268 = vperm.xlu1 %377, %v391_v58  }
 0x217   :  { %271 = vperm.xlu0 %378, %v393_v59  }
 0x291   :  { %v269_v60 = vpop.permute.xlu1 %268 }
 0x292   :  { %v272_v61 = vpop.permute.xlu0 %271  ;;  %v276_v62 = vrot.slane %v269_v60, %v235_v43 }
 0x293   :  { %v280_v63 = vrot.slane %v272_v61, %v235_v43 }
 0x295   :  { %v281_v0 = vsel %vm241_vm3, %v280_v63, %v276_v62 }
 0x296   :  { %v283_v1 = vsel %vm244_vm4, %v281_v0, 0.0 }
 0x297   :  { %284 = vadd.xlane.f32.xlu1 %v283_v1 }
 0x320   :  { %v285_v2 = vpop.xlane.xlu1 %284 }
 0x321   :  { %394 = vrcp.f32 %v285_v2 }
 0x32e   :  { %v395_v3 = vpop.eup %394 }
 0x32f   :  { %v291_v4 = vrot.slane %v395_v3, %v490_v20  ;;  %v295_v6 = vrot.slane %v395_v3, %v255_v50 }
 0x331   :  { %v298_v5 = vmul.f32 %v391_v58, %v291_v4  ;;  %v299_v7 = vmul.f32 %v393_v59, %v295_v6 }
 0x333   :  { %303 = vperm.xlu0 %378, %v298_v5  }
 0x337   :  { %306 = vperm.xlu0 %378, %v299_v7  }
 0x3ae   :  { %v304_v8 = vpop.permute.xlu0 %303 }
 0x3af   :  { %v311_v10 = vrot.slane %v304_v8, %v235_v43 }
 0x3b2   :  { %v307_v9 = vpop.permute.xlu0 %306 }
 0x3b3   :  { %v315_v11 = vrot.slane %v307_v9, %v235_v43 }
 0x3b5   :  { %v316_v12 = vsel %vm241_vm3, %v315_v11, %v311_v10 }
 0x3b6   :  { %318 = vst.msk [vmem:[#allocation2] sm:$0x3] %vm244_vm4, %v316_v12 }
 0x3b7   :  { %407 = shalt.err (!%p404_p4)
}
 0x3b8   :  { %328 = dma.vmem_to_hbm [thread:$0]  %s326_s5, 32, %s518_s6, [#allocation3]  }
 0x3b9   :  { %416 = dma.done.wait [#allocation3], 32  }
 0x3ba   :  { %417 = vsyncadd [#allocation3], 4294967264 }
 0x3bb   :  { %332 = vsyncpa [#allocation3], 1 }

</bundles_post_ra>
